<compile_context>
chip_gen: v6e
topology: v6e:2x2x1
jax: 0.10.0
libtpu: 0.0.40
codegen_flags: <defaults>
</compile_context>

<pallas_src>
import functools
import math

import numpy as np
import jax
import jax.numpy as jnp
from jax.experimental import pallas as pl
from jax.experimental.pallas import tpu as pltpu

# CLIP normalization constants (from the module)
_MEAN = (0.48145466, 0.4578275, 0.40821073)
_STD = (0.26862954, 0.26130258, 0.27577711)


# ---------------------------------------------------------------------------
# Glue: bicubic interpolation matrices (numpy, built once on the host)
# ---------------------------------------------------------------------------
def _cubic_weight(x, a=-0.75):
    ax = abs(float(x))
    if ax <= 1.0:
        return (a + 2.0) * ax**3 - (a + 3.0) * ax**2 + 1.0
    elif ax < 2.0:
        return a * ax**3 - 5.0 * a * ax**2 + 8.0 * a * ax - 4.0 * a
    return 0.0


def _bicubic_resize_matrix(out_size, in_size):
    """Dense (out_size, in_size) matrix for 1-D bicubic resampling
    (align_corners=False, boundary indices clamped)."""
    scale = in_size / out_size
    m = np.zeros((out_size, in_size), dtype=np.float32)
    for i in range(out_size):
        src = (i + 0.5) * scale - 0.5
        f = math.floor(src)
        for k in range(-1, 3):
            idx = f + k
            w = _cubic_weight(src - idx)
            idx_c = min(max(idx, 0), in_size - 1)
            m[i, idx_c] += w
    return m


def _resize_then_crop_matrices(h_in, w_in, image_size):
    """Resize shorter edge to image_size (aspect preserved, torchvision
    Resize([size]) semantics), then fuse the CenterCrop(image_size) row/col
    selection into the interpolation matrices."""
    if h_in <= w_in:
        new_h = image_size
        new_w = int(image_size * w_in / h_in)
    else:
        new_w = image_size
        new_h = int(image_size * h_in / w_in)
    if new_h < image_size or new_w < image_size:
        raise NotImplementedError("CenterCrop padding path not implemented")
    wh_full = _bicubic_resize_matrix(new_h, h_in)   # (new_h, h_in)
    ww_full = _bicubic_resize_matrix(new_w, w_in)   # (new_w, w_in)
    top = int(round((new_h - image_size) / 2.0))
    left = int(round((new_w - image_size) / 2.0))
    wh = wh_full[top:top + image_size]              # (S, h_in)
    ww = ww_full[left:left + image_size]            # (S, w_in)
    return wh, ww


# ---------------------------------------------------------------------------
# Pallas kernel: one full image (all channels) per grid step
# ---------------------------------------------------------------------------
def _transform_kernel(x_ref, wwt_ref, wh_ref, o_ref, *, channels, h_in, bias):
    # x_ref:   (1, C*H, W) uint8   -- raw image tile (contiguous NCHW view)
    # wwt_ref: (W, S) f32          -- width interp matrix, pre-transposed,
    #                                 1/255 folded in (shared across channels)
    # wh_ref:  (C, S, H) f32       -- height interp matrix, per-channel 1/std folded
    # o_ref:   (1, C, S, S) f32
    xf = x_ref[0].astype(jnp.float32)                     # u8 -> f32 cast in VMEM
    # Width resize, batched over all channels in a single MXU matmul.
    u = jnp.dot(xf, wwt_ref[...],
                preferred_element_type=jnp.float32)       # (C*H, S)
    for c in range(channels):                             # tiny unrolled loop (C = 3)
        u_c = u[c * h_in:(c + 1) * h_in]                  # (H, S) static slice
        y = jnp.dot(wh_ref[c], u_c,
                    preferred_element_type=jnp.float32)   # (S, S)
        o_ref[0, c] = y - bias[c]                         # bias[c] = mean_c / std_c


def clip_transform(x_u8, image_size):
    """x_u8: uint8 NCHW image batch. Returns float32 (N, C, S, S)."""
    n, c, h, w = x_u8.shape
    assert c == len(_MEAN), "Normalize constants are defined for 3 channels"
    s = image_size

    wh_np, ww_np = _resize_then_crop_matrices(h, w, s)     # (S, H), (S, W)
    istd = np.asarray([1.0 / v for v in _STD], dtype=np.float32)

    # Fold ConvertImageDtype (1/255) into the shared pre-transposed Ww^T; fold the
    # per-channel 1/std into per-channel Wh; the remaining normalize term is a
    # scalar constant per channel.
    wwt_scaled = (ww_np.T * (1.0 / 255.0)).astype(np.float32)              # (W, S)
    wh_per_c = np.stack([wh_np * istd[i] for i in range(c)], axis=0)       # (C, S, H)
    bias = tuple(float(_MEAN[i] * istd[i]) for i in range(c))

    # Free, metadata-only view of the contiguous NCHW batch: channels folded into
    # the row axis so the first matmul is one (C*H, W) @ (W, S) on the MXU.
    x_flat = x_u8.reshape(n, c * h, w)

    kernel = functools.partial(_transform_kernel, channels=c, h_in=h, bias=bias)

    # VMEM per step (double-buffered): ~2*C*H*W (u8 in) + 2*C*S*S*4 (f32 out)
    # + C*H*W*4 + C*H*S*4 (f32 temps) + weights; tiny for CLIP sizes, comfortably
    # under the 32 MiB scoped default on v6e/v7x.
    return pl.pallas_call(
        kernel,
        out_shape=jax.ShapeDtypeStruct((n, c, s, s), jnp.float32),
        grid=(n,),
        in_specs=[
            pl.BlockSpec((1, c * h, w), lambda i: (i, 0, 0)),   # uint8 image view
            pl.BlockSpec((w, s), lambda i: (0, 0)),             # Ww^T * (1/255)
            pl.BlockSpec((c, s, h), lambda i: (0, 0, 0)),       # Wh * (1/std_c)
        ],
        out_specs=pl.BlockSpec((1, c, s, s), lambda i: (i, 0, 0, 0)),
        compiler_params=pltpu.CompilerParams(
            dimension_semantics=("parallel",)),                 # 2 TCs on v7x
    )(x_flat, jnp.asarray(wwt_scaled), jnp.asarray(wh_per_c))


# ---------------------------------------------------------------------------
# Pure-JAX reference (same math) for a sanity check
# ---------------------------------------------------------------------------
def _reference(x_u8, image_size):
    wh, ww = _resize_then_crop_matrices(x_u8.shape[2], x_u8.shape[3], image_size)
    x = jnp.asarray(x_u8, dtype=jnp.float32) / 255.0
    y = jnp.einsum("sh,nchw->ncsw", jnp.asarray(wh), x)
    y = jnp.einsum("ncsw,tw->ncst", y, jnp.asarray(ww))
    mean = jnp.asarray(_MEAN, dtype=jnp.float32)[None, :, None, None]
    std = jnp.asarray(_STD, dtype=jnp.float32)[None, :, None, None]
    return (y - mean) / std


if __name__ == "__main__":
    image_size = 16
    key = jax.random.PRNGKey(0)
    # small deterministic uint8 NCHW image batch (non-square to exercise the crop)
    x = jax.random.randint(key, (2, 3, 24, 32), 0, 256, dtype=jnp.int32).astype(jnp.uint8)

    out = clip_transform(x, image_size)
    out = jax.block_until_ready(out)

    ref = _reference(x, image_size)
    assert out.shape == (2, 3, image_size, image_size), out.shape
    assert jnp.max(jnp.abs(out - ref)) < 2e-3, float(jnp.max(jnp.abs(out - ref)))

    print("KERNEL_OK")
</pallas_src>

<mosaic_0001>
module attributes {stable_mosaic.version = 11 : i64} {
  func.func @_transform_kernel(%arg0: i32, %arg1: memref<1x72x32xi8, #tpu.memory_space<vmem>>, %arg2: memref<32x16xf32, #tpu.memory_space<vmem>>, %arg3: memref<3x16x24xf32, #tpu.memory_space<vmem>>, %arg4: memref<1x3x16x16xf32, #tpu.memory_space<vmem>>) attributes {dimension_semantics = [#tpu.dimension_semantics<parallel>], iteration_bounds = array<i64: 2>, scalar_prefetch = 0 : i64, scratch_operands = 0 : i64, tpu.core_type = #tpu.core_type<tc>, window_params = [{transform_indices = @transform_0, window_bounds = array<i64: 1, 72, 32>}, {pipeline_mode = #tpu.pipeline_mode<synchronous>, transform_indices = @transform_1, window_bounds = array<i64: 32, 16>}, {pipeline_mode = #tpu.pipeline_mode<synchronous>, transform_indices = @transform_2, window_bounds = array<i64: 3, 16, 24>}, {transform_indices = @transform_3, window_bounds = array<i64: 1, 3, 16, 16>}]} {
    %c0 = arith.constant 0 : index
    %c0_0 = arith.constant 0 : index
    %c0_1 = arith.constant 0 : index
    %0 = vector.load %arg1[%c0, %c0_0, %c0_1] : memref<1x72x32xi8, #tpu.memory_space<vmem>>, vector<1x72x32xi8>
    %1 = vector.shape_cast %0 : vector<1x72x32xi8> to vector<72x32xi8>
    %2 = arith.uitofp %1 : vector<72x32xi8> to vector<72x32xf32>
    %c0_2 = arith.constant 0 : index
    %c0_3 = arith.constant 0 : index
    %3 = vector.load %arg2[%c0_2, %c0_3] : memref<32x16xf32, #tpu.memory_space<vmem>>, vector<32x16xf32>
    %cst = arith.constant dense<0.000000e+00> : vector<72x16xf32>
    %4 = tpu.matmul %2, %3, %cst {dimension_numbers = #tpu.dot_dimension_numbers<[1], [0], [0], [1], [0, 0, 1, 1], [], []>} : vector<72x32xf32>, vector<32x16xf32>, vector<72x16xf32> -> vector<72x16xf32>
    %5 = vector.extract_strided_slice %4 {offsets = [0, 0], sizes = [24, 16], strides = [1, 1]} : vector<72x16xf32> to vector<24x16xf32>
    %c0_4 = arith.constant 0 : index
    %c0_5 = arith.constant 0 : index
    %c0_6 = arith.constant 0 : index
    %6 = vector.load %arg3[%c0_4, %c0_5, %c0_6] : memref<3x16x24xf32, #tpu.memory_space<vmem>>, vector<1x16x24xf32>
    %7 = vector.shape_cast %6 : vector<1x16x24xf32> to vector<16x24xf32>
    %cst_7 = arith.constant dense<0.000000e+00> : vector<16x16xf32>
    %8 = tpu.matmul %7, %5, %cst_7 {dimension_numbers = #tpu.dot_dimension_numbers<[1], [0], [0], [1], [0, 0, 1, 1], [], []>} : vector<16x24xf32>, vector<24x16xf32>, vector<16x16xf32> -> vector<16x16xf32>
    %cst_8 = arith.constant 1.79226255 : f32
    %9 = vector.broadcast %cst_8 : f32 to vector<16x16xf32>
    %10 = arith.subf %8, %9 : vector<16x16xf32>
    %c0_9 = arith.constant 0 : index
    %c0_10 = arith.constant 0 : index
    %c0_11 = arith.constant 0 : index
    %c0_12 = arith.constant 0 : index
    %11 = vector.load %arg4[%c0_9, %c0_10, %c0_11, %c0_12] : memref<1x3x16x16xf32, #tpu.memory_space<vmem>>, vector<1x1x16x16xf32>
    %12 = vector.shape_cast %11 : vector<1x1x16x16xf32> to vector<16x16xf32>
    %13 = vector.shape_cast %10 : vector<16x16xf32> to vector<1x1x16x16xf32>
    tpu.vector_store %arg4[%c0_9, %c0_10, %c0_11, %c0_12], %13 {strides = array<i32>} : memref<1x3x16x16xf32, #tpu.memory_space<vmem>>, vector<1x1x16x16xf32>,
    %14 = vector.extract_strided_slice %4 {offsets = [24, 0], sizes = [24, 16], strides = [1, 1]} : vector<72x16xf32> to vector<24x16xf32>
    %c1 = arith.constant 1 : index
    %c0_13 = arith.constant 0 : index
    %c0_14 = arith.constant 0 : index
    %15 = vector.load %arg3[%c1, %c0_13, %c0_14] : memref<3x16x24xf32, #tpu.memory_space<vmem>>, vector<1x16x24xf32>
    %16 = vector.shape_cast %15 : vector<1x16x24xf32> to vector<16x24xf32>
    %cst_15 = arith.constant dense<0.000000e+00> : vector<16x16xf32>
    %17 = tpu.matmul %16, %14, %cst_15 {dimension_numbers = #tpu.dot_dimension_numbers<[1], [0], [0], [1], [0, 0, 1, 1], [], []>} : vector<16x24xf32>, vector<24x16xf32>, vector<16x16xf32> -> vector<16x16xf32>
    %cst_16 = arith.constant 1.75209725 : f32
    %18 = vector.broadcast %cst_16 : f32 to vector<16x16xf32>
    %19 = arith.subf %17, %18 : vector<16x16xf32>
    %c0_17 = arith.constant 0 : index
    %c1_18 = arith.constant 1 : index
    %c0_19 = arith.constant 0 : index
    %c0_20 = arith.constant 0 : index
    %20 = vector.load %arg4[%c0_17, %c1_18, %c0_19, %c0_20] : memref<1x3x16x16xf32, #tpu.memory_space<vmem>>, vector<1x1x16x16xf32>
    %21 = vector.shape_cast %20 : vector<1x1x16x16xf32> to vector<16x16xf32>
    %22 = vector.shape_cast %19 : vector<16x16xf32> to vector<1x1x16x16xf32>
    tpu.vector_store %arg4[%c0_17, %c1_18, %c0_19, %c0_20], %22 {strides = array<i32>} : memref<1x3x16x16xf32, #tpu.memory_space<vmem>>, vector<1x1x16x16xf32>,
    %23 = vector.extract_strided_slice %4 {offsets = [48, 0], sizes = [24, 16], strides = [1, 1]} : vector<72x16xf32> to vector<24x16xf32>
    %c2 = arith.constant 2 : index
    %c0_21 = arith.constant 0 : index
    %c0_22 = arith.constant 0 : index
    %24 = vector.load %arg3[%c2, %c0_21, %c0_22] : memref<3x16x24xf32, #tpu.memory_space<vmem>>, vector<1x16x24xf32>
    %25 = vector.shape_cast %24 : vector<1x16x24xf32> to vector<16x24xf32>
    %cst_23 = arith.constant dense<0.000000e+00> : vector<16x16xf32>
    %26 = tpu.matmul %25, %23, %cst_23 {dimension_numbers = #tpu.dot_dimension_numbers<[1], [0], [0], [1], [0, 0, 1, 1], [], []>} : vector<16x24xf32>, vector<24x16xf32>, vector<16x16xf32> -> vector<16x16xf32>
    %cst_24 = arith.constant 1.48021972 : f32
    %27 = vector.broadcast %cst_24 : f32 to vector<16x16xf32>
    %28 = arith.subf %26, %27 : vector<16x16xf32>
    %c0_25 = arith.constant 0 : index
    %c2_26 = arith.constant 2 : index
    %c0_27 = arith.constant 0 : index
    %c0_28 = arith.constant 0 : index
    %29 = vector.load %arg4[%c0_25, %c2_26, %c0_27, %c0_28] : memref<1x3x16x16xf32, #tpu.memory_space<vmem>>, vector<1x1x16x16xf32>
    %30 = vector.shape_cast %29 : vector<1x1x16x16xf32> to vector<16x16xf32>
    %31 = vector.shape_cast %28 : vector<16x16xf32> to vector<1x1x16x16xf32>
    tpu.vector_store %arg4[%c0_25, %c2_26, %c0_27, %c0_28], %31 {strides = array<i32>} : memref<1x3x16x16xf32, #tpu.memory_space<vmem>>, vector<1x1x16x16xf32>,
    return
  }
  func.func @transform_0(%arg0: i32) -> (i32, i32, i32) {
    %c0_i32 = arith.constant 0 : i32
    %c0_i32_0 = arith.constant 0 : i32
    %c0_i32_1 = arith.constant 0 : i32
    return %arg0, %c0_i32, %c0_i32_0 : i32, i32, i32
  }
  func.func @transform_1(%arg0: i32) -> (i32, i32) {
    %c0_i32 = arith.constant 0 : i32
    %c0_i32_0 = arith.constant 0 : i32
    %c0_i32_1 = arith.constant 0 : i32
    return %c0_i32, %c0_i32_0 : i32, i32
  }
  func.func @transform_2(%arg0: i32) -> (i32, i32, i32) {
    %c0_i32 = arith.constant 0 : i32
    %c0_i32_0 = arith.constant 0 : i32
    %c0_i32_1 = arith.constant 0 : i32
    %c0_i32_2 = arith.constant 0 : i32
    return %c0_i32, %c0_i32_0, %c0_i32_1 : i32, i32, i32
  }
  func.func @transform_3(%arg0: i32) -> (i32, i32, i32, i32) {
    %c0_i32 = arith.constant 0 : i32
    %c0_i32_0 = arith.constant 0 : i32
    %c0_i32_1 = arith.constant 0 : i32
    %c0_i32_2 = arith.constant 0 : i32
    return %arg0, %c0_i32, %c0_i32_0, %c0_i32_1 : i32, i32, i32, i32
  }
}

</mosaic_0001>

<bundles_post_ra>
// kernel: tpu_custom_call.1
= control target key start
LH: loop header
LB: loop body
LE: loop exit
PB: predicated region body
PF: predicated region fallthrough
CT: control target
= control target key end

     0   :  { %8 = vsyncpa [#allocation3], 0  ;;  %s1156_s0 = inlined_call_operand.vmem [shape: u8[2,72,32], index: 0, kind: input, shape index: {}]   ;;  %s1157_s1 = inlined_call_operand.vmem [shape: f32[32,16], index: 1, kind: input, shape index: {}]   ;;  %s1158_s2 = inlined_call_operand.vmem [shape: f32[3,16,24], index: 2, kind: input, shape index: {}]   ;;  %s1159_s3 = inlined_call_operand.hbm [shape: f32[2,3,16,16], index: 3, kind: output, shape index: {}]  }
   0x1   :  { %10 = vsyncpa [#allocation3 + $0x1], 0  ;;  %s977_s12 = smov 0   ;;  %s979_s13 = smov 0  }
   0x2   :  { %s981_s14 = smov 0   ;;  %s983_s15 = smov 0  }
   0x3 LB: > { %s998_s16 = sadd.s32 4294967295, %s950_s15   ;;  %s690_s17 = sadd.s32 4294967294, %s950_s15   ;;  %s950_s15 = sphi %s983_s15, %s1165_s15   ;;  %s946_s14 = sphi %s981_s14, %s1164_s14   ;;  %s942_s13 = sphi %s979_s13, %s1163_s13   ;;  %s938_s12 = sphi %s977_s12, %s1162_s12  }
   0x4   : > { %s1002_s18 = sadd.s32 1, %s950_s15   ;;  %s91_s19 = sadd.s32 1, %s946_s14 }
   0x5   : > { %s88_s20 = ssub.s32 %s950_s15, %s1002_s18  ;;  %p101_p0 = scmp.ne.s32.totalorder %s946_s14, %s942_s13 }
   0x6   : > { %p89_p1 = scmp.eq.s32.totalorder %s88_s20, 0  ;;  %p102_p2 = scmp.eq.s32.totalorder %s998_s16, 1 }
   0x7   : > { %p107_p3 = scmp.ne.s32.totalorder %s942_s13, %s938_s12  ;;  %p108_p4 = scmp.eq.s32.totalorder %s690_s17, 1 }
   0x8   : > { %s1013_s21 = scalar_select %p89_p1, %s946_s14, %s91_s19  }
   0x9   : > { %p1015_p5 = por %p102_p2, %p101_p0  ;;  %p1019_p6 = por %p108_p4, %p107_p3 }
   0xa   : > { %p693_p7 = scmp.ge.s32.totalorder %s950_s15, 1  ;;  %p140_p8 = scmp.lt.s32.totalorder %s950_s15, 3 }
   0xc   : > { %p141_p9 = pnand %p693_p7, %p140_p8 }
   0xd   : > { %p164_p10 = scmp.lt.s32.totalorder (!%p141_p9), %s998_s16, 1  ;;  %s846_s7 = smul.u32 (!%p141_p9), 768, %s998_s16 }
   0xe   : > { %144 = sbr.rel (%p141_p9) target bundleno = 467 (0x1d3), region = 32  ;;  %s954_s19 = smov (!%p141_p9), [#allocation2]  }
   0xf   : > { %s1110_s11 = scalar_lea.hbm (!%p141_p9), %s1159_s3, %s846_s7  ;;  %s894_s20 = sshll.u32 (!%p141_p9), %s954_s19, 4  ;;  %s895_s20 = int_to_ptr.vmem [resolvable:$false] %s894_s20 }
  0x10   : > { %s896_s24 = scalar_lea.vmem (!%p141_p9), %s895_s20, 1536 }
  0x13   : > { %v208_v0 = vld [vmem:[%s1157_s1 + $0x18] sm:$0xff]  ;;  %v952_v1 = vmov 0.0   ;;  %v207_v2 = vld [vmem:[%s1157_s1 + $0x10] sm:$0xff]  ;;  %vm953_vm0 = vmmov 0   ;;  %s165_s28 = scalar_select %p164_p10, %s998_s16, 1  ;;  %v206_v3 = vld [vmem:[%s1157_s1 + $0x8] sm:$0xff] }
  0x14   : > { %771 = vmatprep.subr.mxu0 %v952_v1  ;;  %779 = vmatprep.mubr.msk.f32.mxu0 %vm953_vm0, %v952_v1  ;;  %v205_v4 = vld [vmem:[%s1157_s1] sm:$0xff]  ;;  %vm209_vm1 = vcmask 261120   ;;  %vm349_vm2 = vcmask 195584   ;;  %v348_v47 = vld [vmem:[%s1158_s2 + $0x8] sm:$0xff]  ;;  %v708_v48 = vld [vmem:[%s1158_s2 + $0x10] sm:$0xff]  ;;  %vm433_vm3 = vcmask 130048  }
  0x15   : > { %772 = vmatpush3.msra.mxu0 %v208_v0  ;;  %833 = vmatprep.subr.mxu1 %v952_v1  ;;  %s845_s4 = smul.u32 18, %s165_s28  ;;  %v347_v35 = vld [vmem:[%s1158_s2] sm:$0xff]  ;;  %v709_v54 = vld [vmem:[%s1158_s2 + $0x18] sm:$0xff]  ;;  %v717_v58 = vld [vmem:[%s1158_s2 + $0x28] sm:$0xff] }
  0x16   : > { %773 = vmatprep.subr.mxu0 %v952_v1  ;;  %837 = vmatpush3.msra.mxu1 %v208_v0  ;;  %v716_v56 = vld [vmem:[%s1158_s2 + $0x20] sm:$0xff] }
  0x17   : > { %774 = vmatpush3.msra.mxu0 %v207_v2  ;;  %834 = vmatprep.subr.mxu1 %v952_v1  ;;  %s168_s9 = scalar_lea.vmem %s1156_s0, %s845_s4  ;;  %s161_s4 = sand.u32 1, %s942_s13  }
  0x18   : > { %775 = vmatprep.subr.mxu0 %v952_v1  ;;  %838 = vmatpush3.msra.mxu1 %v207_v2  ;;  %v728_v5 = vld [vmem:[%s168_s9] sm:$0xff]   ;;  %v177_v6 = vld [vmem:[%s168_s9 + $0x10] sm:$0x3]  ;;  %v842_v9 = vld [vmem:[%s168_s9 + $0x8] sm:$0xff]   ;;  %s844_s5 = smul.u32 48, %s161_s4  ;;  %s1116_s16 = scalar_lea.sflag [#allocation3], %s161_s4 }
  0x19   : > { %776 = vmatpush3.msra.mxu0 %v206_v3  ;;  %835 = vmatprep.subr.mxu1 %v952_v1  ;;  %v729_v7 = vunpack.c.0.s8 %v728_v5  ;;  %v730_v8 = vunpack.c.1.s8 %v728_v5  ;;  %v742_v10 = vunpack.c.3.s8 %v842_v9  ;;  %v186_v11 = vunpack.c.0.s8 %v177_v6 }
  0x1a   : > { %777 = vmatprep.subr.mxu0 %v952_v1  ;;  %839 = vmatpush3.msra.mxu1 %v206_v3  ;;  %v733_v14 = vunpack.c.2.s8 %v728_v5  ;;  %v734_v21 = vunpack.c.3.s8 %v728_v5  ;;  %v737_v25 = vunpack.c.0.s8 %v842_v9  ;;  %v738_v28 = vunpack.c.1.s8 %v842_v9  ;;  %s163_s6 = scalar_lea.vmem [#allocation2], %s844_s5 }
  0x1b   : > { %778 = vmatpush3.msra.mxu0 %v205_v4  ;;  %836 = vmatprep.subr.mxu1 %v952_v1  ;;  %v187_v12 = vand.u32 255, %v729_v7  ;;  %v188_v13 = vand.u32 255, %v730_v8  ;;  %v194_v15 = vand.u32 255, %v742_v10  ;;  %v195_v16 = vand.u32 255, %v186_v11  ;;  %s628_s8 = sshll.u32 %s163_s6, 4  ;;  %s1112_s8 = int_to_ptr.vmem [resolvable:$true] %s628_s8 }
  0x1c   : > { %840 = vmatpush3.msra.mxu1 %v205_v4  ;;  %800 = vmatprep.mubr.msk.f32.mxu1 %vm953_vm0, %v952_v1  ;;  %v189_v20 = vand.u32 255, %v733_v14  ;;  %v190_v24 = vand.u32 255, %v734_v21  ;;  %v191_v27 = vand.u32 255, %v737_v25  ;;  %v192_v30 = vand.u32 255, %v738_v28  ;;  %s890_s17 = scalar_lea.vmem %s1112_s8, 768  ;;  %p897_p0 = scmp.lt.s32.totalorder %s1112_s8, %s895_s20 }
  0x1d   : > { %v196_v17 = vcvt.s32.f32 %v187_v12  ;;  %v203_v18 = vcvt.s32.f32 %v194_v15  ;;  %v197_v19 = vcvt.s32.f32 %v188_v13  ;;  %v204_v22 = vcvt.s32.f32 %v195_v16  ;;  %p891_p11 = scmp.ne.s32.totalorder %s1112_s8, %s890_s17  ;;  %p898_p1 = scmp.lt.s32.totalorder %s896_s24, %s890_s17 }
  0x1e   : > { %v198_v23 = vcvt.s32.f32 %v189_v20  ;;  %v199_v26 = vcvt.s32.f32 %v190_v24  ;;  %v200_v29 = vcvt.s32.f32 %v191_v27  ;;  %v741_v31 = vunpack.c.2.s8 %v842_v9 }
  0x1f   : > { %780 = vmatmul.mubr.msk.f32.vlgmr.msra.gmra.mxu0 %vm209_vm1, %v196_v17  ;;  %801 = vmatmul.mubr.msk.f32.vlgmr.msra.gmra.mxu1 %vm209_vm1, %v203_v18  ;;  %v201_v32 = vcvt.s32.f32 %v192_v30  ;;  %p892_p12 = pnand %p891_p11, %p1015_p5  ;;  %p899_p2 = por %p898_p1, %p897_p0 }
  0x20   : > { %782 = vmatprep.mubr.msk.f32.mxu0 %vm953_vm0, %v952_v1  ;;  %803 = vmatprep.mubr.msk.f32.mxu1 %vm953_vm0, %v952_v1  ;;  %v193_v33 = vand.u32 255, %v741_v31 }
  0x21   : > { %p893_p13 = pneg %p892_p12 }
  0x22   : > { %v202_v34 = vcvt.s32.f32 %v193_v33 }
  0x23   : > { %783 = vmatmul.mubr.msk.f32.gmra.mxu0 %vm209_vm1, %v197_v19  ;;  %804 = vmatmul.mubr.msk.f32.gmra.mxu1 %vm209_vm1, %v204_v22  ;;  %p900_p3 = pnand %p899_p2, %p893_p13 }
  0x24   : > { %785 = vmatprep.mubr.msk.f32.mxu0 %vm953_vm0, %v952_v1  ;;  %812 = vmatprep.mubr.msk.f32.mxu1 %vm349_vm2, %v347_v35 }
  0x27   : > { %786 = vmatmul.mubr.msk.f32.gmra.mxu0 %vm209_vm1, %v198_v23 }
  0x28   : > { %788 = vmatprep.mubr.msk.f32.mxu0 %vm953_vm0, %v952_v1 }
  0x2b   : > { %789 = vmatmul.mubr.msk.f32.gmra.mxu0 %vm209_vm1, %v199_v26 }
  0x2c   : > { %791 = vmatprep.mubr.msk.f32.mxu0 %vm953_vm0, %v952_v1 }
  0x2f   : > { %792 = vmatmul.mubr.msk.f32.gmra.mxu0 %vm209_vm1, %v200_v29 }
  0x30   : > { %794 = vmatprep.mubr.msk.f32.mxu0 %vm953_vm0, %v952_v1 }
  0x33   : > { %795 = vmatmul.mubr.msk.f32.gmra.mxu0 %vm209_vm1, %v201_v32 }
  0x34   : > { %797 = vmatprep.mubr.msk.f32.mxu0 %vm953_vm0, %v952_v1 }
  0x37   : > { %798 = vmatmul.mubr.msk.f32.gmra.mxu0 %vm209_vm1, %v202_v34 }
  0xdf   : > { %v303_v36 = vpop.f32.mrf.mxu0  ;;  %v338_v37 = vpop.f32.mrf.mxu1 }
  0xe1   : > { %v781_v38 = vpop.f32.mrf.mxu0  ;;  %v802_v39 = vpop.f32.mrf.mxu1 }
  0xe3   : > { %v308_v40 = vpop.f32.mrf.mxu0  ;;  %v343_v41 = vpop.f32.mrf.mxu1 }
  0xe5   : > { %v784_v42 = vpop.f32.mrf.mxu0  ;;  %v805_v43 = vpop.f32.mrf.mxu1 }
  0xe7   : > { %v313_v44 = vpop.f32.mrf.mxu0 }
  0xe8   : > { %806 = vmatprep.subr.mxu1 %v313_v44 }
  0xe9   : > { %v787_v45 = vpop.f32.mrf.mxu0  ;;  %807 = vmatpush3.msra.mxu1 %v313_v44 }
  0xea   : > { %808 = vmatprep.subr.mxu1 %v308_v40 }
  0xeb   : > { %v318_v46 = vpop.f32.mrf.mxu0  ;;  %809 = vmatpush3.msra.mxu1 %v308_v40 }
  0xec   : > { %810 = vmatprep.subr.mxu1 %v303_v36 }
  0xed   : > { %v790_v49 = vpop.f32.mrf.mxu0  ;;  %811 = vmatpush3.msra.mxu1 %v303_v36 }
  0xee   : > { %813 = vmatmul.mubr.msk.f32.vlgmr.msra.gmra.mxu1 %vm349_vm2, %v348_v47 }
  0xef   : > { %v323_v50 = vpop.f32.mrf.mxu0  ;;  %821 = vmatprep.mubr.msk.f32.mxu1 %vm349_vm2, %v708_v48 }
  0xf1   : > { %v793_v51 = vpop.f32.mrf.mxu0 }
  0xf3   : > { %v328_v52 = vpop.f32.mrf.mxu0 }
  0xf4   : > { %815 = vmatprep.subr.mxu1 %v328_v52 }
  0xf5   : > { %v796_v53 = vpop.f32.mrf.mxu0  ;;  %816 = vmatpush3.msra.mxu1 %v328_v52 }
  0xf6   : > { %817 = vmatprep.subr.mxu1 %v323_v50 }
  0xf7   : > { %818 = vmatpush3.msra.mxu1 %v323_v50  ;;  %v333_v55 = vpop.f32.mrf.mxu0 }
  0xf8   : > { %819 = vmatprep.subr.mxu1 %v318_v46 }
  0xf9   : > { %820 = vmatpush3.msra.mxu1 %v318_v46  ;;  %v799_v57 = vpop.f32.mrf.mxu0 }
  0xfa   : > { %822 = vmatmul.mubr.msk.f32.vlgmr.msra.gmra.mxu1 %vm349_vm2, %v709_v54  ;;  %824 = vmatprep.subr.mxu1 %v343_v41 }
  0xfb   : > { %825 = vmatpush3.msra.mxu1 %v343_v41  ;;  %830 = vmatprep.mubr.msk.f32.mxu1 %vm349_vm2, %v716_v56 }
  0xfc   : > { %826 = vmatprep.subr.mxu1 %v338_v37 }
  0xfd   : > { %827 = vmatpush3.msra.mxu1 %v338_v37 }
  0xfe   : > { %828 = vmatprep.subr.mxu1 %v333_v55 }
  0xff   : > { %829 = vmatpush3.msra.mxu1 %v333_v55 }
 0x100   : > { %831 = vmatmul.mubr.msk.f32.vlgmr.msra.gmra.mxu1 %vm349_vm2, %v717_v58 }
 0x1ae   : > { %v814_v59 = vpop.f32.mrf.mxu1 }
 0x1af   : > { %v707_v60 = vadd.f32 -1.7922626, %v814_v59 }
 0x1b0   : > { %v422_v61 = vpop.f32.mrf.mxu1 }
 0x1b1   : > { %435 = vst.msk [vmem:[%s163_s6 + $0x8] sm:$0xff] %vm433_vm3, %v707_v60  ;;  %v706_v62 = vadd.f32 -1.7922626, %v422_v61 }
 0x1b3   : > { %434 = vst.msk [vmem:[%s163_s6] sm:$0xff] %vm433_vm3, %v706_v62 }
 0x1ba   : > { %v823_v63 = vpop.f32.mrf.mxu1 }
 0x1bb   : > { %v713_v0 = vadd.f32 -1.7520972, %v823_v63 }
 0x1bc   : > { %v511_v1 = vpop.f32.mrf.mxu1 }
 0x1bd   : > { %715 = vst.msk [vmem:[%s163_s6 + $0x18] sm:$0xff] %vm433_vm3, %v713_v0  ;;  %v712_v2 = vadd.f32 -1.7520972, %v511_v1 }
 0x1bf   : > { %714 = vst.msk [vmem:[%s163_s6 + $0x10] sm:$0xff] %vm433_vm3, %v712_v2 }
 0x1c0   : > { %v832_v3 = vpop.f32.mrf.mxu1 }
 0x1c1   : > { %v721_v4 = vadd.f32 -1.4802197, %v832_v3 }
 0x1c2   : > { %v600_v5 = vpop.f32.mrf.mxu1 }
 0x1c3   : > { %723 = vst.msk [vmem:[%s163_s6 + $0x28] sm:$0xff] %vm433_vm3, %v721_v4  ;;  %v720_v6 = vadd.f32 -1.4802197, %v600_v5 }
 0x1c5   : > { %722 = vst.msk [vmem:[%s163_s6 + $0x20] sm:$0xff] %vm433_vm3, %v720_v6 }
 0x1c6   : > { %903 = shalt.err (!%p900_p3)
}
 0x1c7   : > { %s904_s25 = scalar_lea.hbm %s1110_s11, 768  ;;  %s908_s28 = scalar_lea.hbm %s1159_s3, 1536 }
 0x1c8   : > { %p905_p4 = scmp.ne.s32.totalorder %s1110_s11, %s904_s25  ;;  %p909_p9 = scmp.lt.s32.totalorder %s1110_s11, %s1159_s3 }
 0x1c9   : > { %p910_p10 = scmp.lt.s32.totalorder %s908_s28, %s904_s25 }
 0x1ca   : > { %p906_p7 = pnand %p905_p4, %p1015_p5 }
 0x1cb   : > { %p911_p11 = por %p910_p10, %p909_p9 }
 0x1cc   : > { %p907_p8 = pneg %p906_p7 }
 0x1ce   : > { %p912_p12 = pnand %p911_p11, %p907_p8 }
 0x1d0   : > { %915 = shalt.err (!%p912_p12)
}
 0x1d1   : > { %s955_s4 = smov 128   ;;  %s956_s5 = smov 8  }
 0x1d2   : > { %847 = dma.vmem_to_hbm [thread:$0]  (%p1015_p5), %s1112_s8, 768, %s1110_s11, %s1116_s16, %s955_s4, %s955_s4, %s956_s5  }
 0x1d3 PF: > { %p853_p13 = scmp.ge.s32.totalorder %s950_s15, 2  ;;  %s643_s6 = sand.u32 1, %s938_s12  }
 0x1d4   : > { %s644_s7 = scalar_lea.sflag [#allocation3], %s643_s6 }
 0x1d5   : > { %p850_p0 = pnand %p853_p13, %p1019_p6 }
 0x1d7   : > { %p851_p1 = pneg %p850_p0 }
 0x1d9   : > { %933 = dma.done.wait (%p851_p1), %s644_s7, 768  }
 0x1da   : > { %935 = vsyncadd (%p851_p1), %s644_s7, 4294966528  ;;  %p13_p2 = scmp.ge.s32.totalorder %s1002_s18, 4   ;;  %s1162_s12 = smov %s942_s13 }
 0x1db   : > { %s1163_s13 = smov %s946_s14  ;;  %s1164_s14 = smov %s1013_s21 }
 0x1dc   : > { %s1165_s15 = smov %s1002_s18  ;;  %15 = sbr.rel (!%p13_p2) target bundleno = 3 (0x3), region = 71 }
 0x1e1   :  { %649 = vsyncpa [#allocation3], 1 }
 0x1e2   :  { %651 = vsyncpa [#allocation3 + $0x1], 1 }

</bundles_post_ra>
